<compile_context>
chip_gen: v7x
topology: tpu7x:2x2x1
jax: 0.10.0
libtpu: 0.0.40
codegen_flags: <defaults>
</compile_context>

<pallas_src>
import functools

import jax
import jax.numpy as jnp
from jax.experimental import pallas as pl
from jax.experimental.pallas import tpu as pltpu


def _round_down_128(x):
    return (x // 128) * 128


def _sum_mse_cosine_loss_kernel(pred_ref, targ_ref, dev_ref, part_ref, *,
                                total_b, tb):
    """One (D, TB) tile of the transposed inputs.

    pred_ref, targ_ref : (D, TB)  inputs (any float dtype, cast to f32)
    dev_ref            : (3, TB)  |pred_dir_n - targ_dir_n| for this tile
    part_ref           : (1, 1, 128) per-block partial sums
                         lane 0 = sum cos, lane 1 = sum (pmag-tmag)^2,
                         lane 2 = sum gripper squared error
    """
    i = pl.program_id(0)

    pred = pred_ref[...].astype(jnp.float32)  # (D, TB)
    targ = targ_ref[...].astype(jnp.float32)

    # Mask padded / out-of-bounds columns of the (possibly ragged) last tile.
    col = jax.lax.broadcasted_iota(jnp.int32, (1, tb), 1) + i * tb
    valid = col < total_b                                     # (1, TB)
    pred = jnp.where(valid, pred, jnp.float32(0.0))
    targ = jnp.where(valid, targ, jnp.float32(0.0))

    # --- direction / magnitude split (rows 0:3 = translation direction) ---
    pd = pred[:3, :]                                          # (3, TB)
    td = targ[:3, :]
    pmag = jnp.sqrt(jnp.sum(pd * pd, axis=0, keepdims=True))  # (1, TB)
    tmag = jnp.sqrt(jnp.sum(td * td, axis=0, keepdims=True))

    # --- F.normalize(dim=1): x / clamp_min(||x||, 1e-12) ---
    eps_norm = jnp.float32(1e-12)
    pdn = pd / jnp.maximum(pmag, eps_norm)                    # (3, TB)
    tdn = td / jnp.maximum(tmag, eps_norm)

    # --- cosine similarity (eps=1e-8) on the already-normalized vectors ---
    eps_cos = jnp.float32(1e-8)
    dot = jnp.sum(pdn * tdn, axis=0, keepdims=True)           # (1, TB)
    pn = jnp.sqrt(jnp.sum(pdn * pdn, axis=0, keepdims=True))
    tn = jnp.sqrt(jnp.sum(tdn * tdn, axis=0, keepdims=True))
    cos = dot / jnp.maximum(pn * tn, eps_cos)                 # (1, TB)

    # --- per-column squared errors (padded columns contribute exactly 0) ---
    mag_sq = (pmag - tmag) ** 2                               # (1, TB)
    pg = pred[3:, :]
    tg = targ[3:, :]
    grip_sq = jnp.sum((pg - tg) ** 2, axis=0, keepdims=True)  # (1, TB)

    sum_cos = jnp.sum(cos)
    sum_mag = jnp.sum(mag_sq)
    sum_grip = jnp.sum(grip_sq)

    lane = jax.lax.broadcasted_iota(jnp.int32, (1, 1, 128), 2)
    part = jnp.where(
        lane == 0, sum_cos,
        jnp.where(lane == 1, sum_mag,
                  jnp.where(lane == 2, sum_grip, jnp.float32(0.0))))
    part_ref[...] = part

    dev_ref[...] = jnp.abs(pdn - tdn)                         # (3, TB)


def sum_mse_cosine_loss(predictions, targets, *, block_b=4096):
    """Pallas TPU implementation of SumMSECosineLoss.forward.

    predictions, targets: (B, D) float arrays (f32 or bf16), D >= 4.
    Returns (scalar total_loss f32, (B, 3) f32 deviations).
    """
    B, D = predictions.shape
    assert targets.shape == (B, D) and D >= 4

    block_b = max(128, _round_down_128(block_b))

    # Lane-dense layout: batch on the 128-wide lane axis.
    pred_t = predictions.T                                    # (D, B)
    targ_t = targets.T

    if B < 128:
        # Tiny batch: pad columns up to one full lane tile (zeros contribute
        # nothing to the sums; masked in-kernel anyway).
        b_arr = 128
        pred_t = jnp.pad(pred_t, ((0, 0), (0, b_arr - B)))
        targ_t = jnp.pad(targ_t, ((0, 0), (0, b_arr - B)))
        tb = 128
    else:
        b_arr = B
        tb = min(block_b, _round_down_128(B))                 # multiple of 128, <= B

    num_blocks = pl.cdiv(b_arr, tb)

    kernel = functools.partial(_sum_mse_cosine_loss_kernel, total_b=B, tb=tb)

    dev_t, partials = pl.pallas_call(
        kernel,
        grid=(num_blocks,),
        out_shape=(
            jax.ShapeDtypeStruct((3, b_arr), jnp.float32),
            jax.ShapeDtypeStruct((num_blocks, 1, 128), jnp.float32),
        ),
        in_specs=[
            pl.BlockSpec((D, tb), lambda i: (0, i)),
            pl.BlockSpec((D, tb), lambda i: (0, i)),
        ],
        out_specs=(
            pl.BlockSpec((3, tb), lambda i: (0, i)),
            pl.BlockSpec((1, 1, 128), lambda i: (i, 0, 0)),
        ),
        compiler_params=pltpu.CompilerParams(
            dimension_semantics=("parallel",)),
    )(pred_t, targ_t)

    # Tiny final reduction over per-block partial sums (raw sums -> one divide).
    sums = jnp.sum(partials, axis=(0, 1))                     # (128,)
    sum_cos, sum_mag, sum_grip = sums[0], sums[1], sums[2]
    n = jnp.float32(B)
    direction_loss = jnp.float32(1.0) - sum_cos / n
    magnitude_loss = sum_mag / n
    mse_gripper = jnp.float32(2.0) * sum_grip / (n * jnp.float32(D - 3))
    total = direction_loss + magnitude_loss + mse_gripper

    deviations = dev_t[:, :B].T                               # (B, 3)
    return total, deviations


def _reference(predictions, targets):
    """Pure-JAX reference mirroring the PyTorch forward (for verification)."""
    pred = predictions.astype(jnp.float32)
    targ = targets.astype(jnp.float32)
    pd, td = pred[:, :3], targ[:, :3]
    pmag = jnp.linalg.norm(pd, axis=1, keepdims=True)
    tmag = jnp.linalg.norm(td, axis=1, keepdims=True)
    pdn = pd / jnp.maximum(pmag, 1e-12)
    tdn = td / jnp.maximum(tmag, 1e-12)
    cos = jnp.sum(pdn * tdn, axis=1) / jnp.maximum(
        jnp.linalg.norm(pdn, axis=1) * jnp.linalg.norm(tdn, axis=1), 1e-8)
    direction_loss = 1.0 - jnp.mean(cos)
    magnitude_loss = jnp.mean((pmag - tmag) ** 2)
    mse_gripper = 2.0 * jnp.mean((pred[:, 3:] - targ[:, 3:]) ** 2)
    return direction_loss + magnitude_loss + mse_gripper, jnp.abs(pdn - tdn)


if __name__ == "__main__":
    # Case 1: small batch (single padded tile path).
    B, D = 8, 7
    kp, kt = jax.random.split(jax.random.PRNGKey(0))
    predictions = jax.random.normal(kp, (B, D), dtype=jnp.float32)
    targets = jax.random.normal(kt, (B, D), dtype=jnp.float32)

    total_loss, deviations = jax.jit(sum_mse_cosine_loss)(predictions, targets)
    jax.block_until_ready((total_loss, deviations))

    ref_loss, ref_dev = _reference(predictions, targets)
    assert deviations.shape == (B, 3)
    assert jnp.allclose(total_loss, ref_loss, atol=1e-5, rtol=1e-5)
    assert jnp.allclose(deviations, ref_dev, atol=1e-5, rtol=1e-5)

    # Case 2: multi-block grid with a ragged last tile (exercises masking +
    # per-block partial-sum accumulation).
    B2 = 300
    kp2, kt2 = jax.random.split(jax.random.PRNGKey(1))
    p2 = jax.random.normal(kp2, (B2, D), dtype=jnp.float32)
    t2 = jax.random.normal(kt2, (B2, D), dtype=jnp.float32)

    fn2 = jax.jit(functools.partial(sum_mse_cosine_loss, block_b=128))
    loss2, dev2 = fn2(p2, t2)
    jax.block_until_ready((loss2, dev2))

    ref_loss2, ref_dev2 = _reference(p2, t2)
    assert dev2.shape == (B2, 3)
    assert jnp.allclose(loss2, ref_loss2, atol=1e-5, rtol=1e-5)
    assert jnp.allclose(dev2, ref_dev2, atol=1e-5, rtol=1e-5)

    print("KERNEL_OK")
</pallas_src>

<mosaic_0001>
module attributes {stable_mosaic.version = 11 : i64} {
  func.func @_sum_mse_cosine_loss_kernel(%arg0: i32, %arg1: memref<7x128xf32, #tpu.memory_space<vmem>>, %arg2: memref<7x128xf32, #tpu.memory_space<vmem>>, %arg3: memref<3x128xf32, #tpu.memory_space<vmem>>, %arg4: memref<1x1x128xf32, #tpu.memory_space<vmem>>) attributes {dimension_semantics = [#tpu.dimension_semantics<parallel>], iteration_bounds = array<i64: 1>, scalar_prefetch = 0 : i64, scratch_operands = 0 : i64, tpu.core_type = #tpu.core_type<tc>, window_params = [{transform_indices = @transform_0, window_bounds = array<i64: 7, 128>}, {transform_indices = @transform_1, window_bounds = array<i64: 7, 128>}, {transform_indices = @transform_2, window_bounds = array<i64: 3, 128>}, {transform_indices = @transform_3, window_bounds = array<i64: 1, 1, 128>}]} {
    %c0 = arith.constant 0 : index
    %c0_0 = arith.constant 0 : index
    %0 = vector.load %arg1[%c0, %c0_0] : memref<7x128xf32, #tpu.memory_space<vmem>>, vector<7x128xf32>
    %c0_1 = arith.constant 0 : index
    %c0_2 = arith.constant 0 : index
    %1 = vector.load %arg2[%c0_1, %c0_2] : memref<7x128xf32, #tpu.memory_space<vmem>>, vector<7x128xf32>
    %2 = tpu.iota {dimensions = array<i32: 1>} : vector<1x128xi32>
    %c128_i32 = arith.constant 128 : i32
    %3 = arith.muli %arg0, %c128_i32 : i32
    %4 = vector.broadcast %3 : i32 to vector<1x128xi32>
    %5 = arith.addi %2, %4 : vector<1x128xi32>
    %c8_i32 = arith.constant 8 : i32
    %6 = vector.broadcast %c8_i32 : i32 to vector<1x128xi32>
    %7 = arith.cmpi slt, %5, %6 : vector<1x128xi32>
    %cst = arith.constant 0.000000e+00 : f32
    %8 = vector.shape_cast %7 : vector<1x128xi1> to vector<1x128xi1>
    %9 = vector.broadcast %8 : vector<1x128xi1> to vector<7x128xi1>
    %10 = vector.broadcast %cst : f32 to vector<7x128xf32>
    %11 = arith.select %9, %0, %10 : vector<7x128xi1>, vector<7x128xf32>
    %cst_3 = arith.constant 0.000000e+00 : f32
    %12 = vector.shape_cast %7 : vector<1x128xi1> to vector<1x128xi1>
    %13 = vector.broadcast %12 : vector<1x128xi1> to vector<7x128xi1>
    %14 = vector.broadcast %cst_3 : f32 to vector<7x128xf32>
    %15 = arith.select %13, %1, %14 : vector<7x128xi1>, vector<7x128xf32>
    %16 = vector.extract_strided_slice %11 {offsets = [0, 0], sizes = [3, 128], strides = [1, 1]} : vector<7x128xf32> to vector<3x128xf32>
    %17 = vector.extract_strided_slice %15 {offsets = [0, 0], sizes = [3, 128], strides = [1, 1]} : vector<7x128xf32> to vector<3x128xf32>
    %18 = arith.mulf %16, %16 : vector<3x128xf32>
    %cst_4 = arith.constant dense<0.000000e+00> : vector<128xf32>
    %19 = vector.multi_reduction <add>, %18, %cst_4 [0] : vector<3x128xf32> to vector<128xf32>
    %20 = vector.shape_cast %19 : vector<128xf32> to vector<1x128xf32>
    %21 = math.sqrt %20 : vector<1x128xf32>
    %22 = arith.mulf %17, %17 : vector<3x128xf32>
    %cst_5 = arith.constant dense<0.000000e+00> : vector<128xf32>
    %23 = vector.multi_reduction <add>, %22, %cst_5 [0] : vector<3x128xf32> to vector<128xf32>
    %24 = vector.shape_cast %23 : vector<128xf32> to vector<1x128xf32>
    %25 = math.sqrt %24 : vector<1x128xf32>
    %cst_6 = arith.constant 9.99999996E-13 : f32
    %26 = vector.broadcast %cst_6 : f32 to vector<1x128xf32>
    %27 = arith.maximumf %21, %26 : vector<1x128xf32>
    %28 = vector.broadcast %27 : vector<1x128xf32> to vector<3x128xf32>
    %29 = arith.divf %16, %28 : vector<3x128xf32>
    %cst_7 = arith.constant 9.99999996E-13 : f32
    %30 = vector.broadcast %cst_7 : f32 to vector<1x128xf32>
    %31 = arith.maximumf %25, %30 : vector<1x128xf32>
    %32 = vector.broadcast %31 : vector<1x128xf32> to vector<3x128xf32>
    %33 = arith.divf %17, %32 : vector<3x128xf32>
    %34 = arith.mulf %29, %33 : vector<3x128xf32>
    %cst_8 = arith.constant dense<0.000000e+00> : vector<128xf32>
    %35 = vector.multi_reduction <add>, %34, %cst_8 [0] : vector<3x128xf32> to vector<128xf32>
    %36 = vector.shape_cast %35 : vector<128xf32> to vector<1x128xf32>
    %37 = arith.mulf %29, %29 : vector<3x128xf32>
    %cst_9 = arith.constant dense<0.000000e+00> : vector<128xf32>
    %38 = vector.multi_reduction <add>, %37, %cst_9 [0] : vector<3x128xf32> to vector<128xf32>
    %39 = vector.shape_cast %38 : vector<128xf32> to vector<1x128xf32>
    %40 = math.sqrt %39 : vector<1x128xf32>
    %41 = arith.mulf %33, %33 : vector<3x128xf32>
    %cst_10 = arith.constant dense<0.000000e+00> : vector<128xf32>
    %42 = vector.multi_reduction <add>, %41, %cst_10 [0] : vector<3x128xf32> to vector<128xf32>
    %43 = vector.shape_cast %42 : vector<128xf32> to vector<1x128xf32>
    %44 = math.sqrt %43 : vector<1x128xf32>
    %45 = arith.mulf %40, %44 : vector<1x128xf32>
    %cst_11 = arith.constant 9.99999993E-9 : f32
    %46 = vector.broadcast %cst_11 : f32 to vector<1x128xf32>
    %47 = arith.maximumf %45, %46 : vector<1x128xf32>
    %48 = arith.divf %36, %47 : vector<1x128xf32>
    %49 = arith.subf %21, %25 : vector<1x128xf32>
    %50 = arith.mulf %49, %49 : vector<1x128xf32>
    %51 = vector.extract_strided_slice %11 {offsets = [3, 0], sizes = [4, 128], strides = [1, 1]} : vector<7x128xf32> to vector<4x128xf32>
    %52 = vector.extract_strided_slice %15 {offsets = [3, 0], sizes = [4, 128], strides = [1, 1]} : vector<7x128xf32> to vector<4x128xf32>
    %53 = arith.subf %51, %52 : vector<4x128xf32>
    %54 = arith.mulf %53, %53 : vector<4x128xf32>
    %cst_12 = arith.constant dense<0.000000e+00> : vector<128xf32>
    %55 = vector.multi_reduction <add>, %54, %cst_12 [0] : vector<4x128xf32> to vector<128xf32>
    %56 = vector.shape_cast %55 : vector<128xf32> to vector<1x128xf32>
    %57 = vector.shape_cast %48 : vector<1x128xf32> to vector<1x1x128xf32>
    %cst_13 = arith.constant dense<0.000000e+00> : vector<1xf32>
    %58 = vector.multi_reduction <add>, %57, %cst_13 [1, 2] : vector<1x1x128xf32> to vector<1xf32>
    %59 = vector.shape_cast %58 : vector<1xf32> to vector<1x1x1xf32>
    %60 = vector.extract %59[0, 0, 0] : f32 from vector<1x1x1xf32>
    %61 = vector.shape_cast %50 : vector<1x128xf32> to vector<1x1x128xf32>
    %cst_14 = arith.constant dense<0.000000e+00> : vector<1xf32>
    %62 = vector.multi_reduction <add>, %61, %cst_14 [1, 2] : vector<1x1x128xf32> to vector<1xf32>
    %63 = vector.shape_cast %62 : vector<1xf32> to vector<1x1x1xf32>
    %64 = vector.extract %63[0, 0, 0] : f32 from vector<1x1x1xf32>
    %65 = vector.shape_cast %56 : vector<1x128xf32> to vector<1x1x128xf32>
    %cst_15 = arith.constant dense<0.000000e+00> : vector<1xf32>
    %66 = vector.multi_reduction <add>, %65, %cst_15 [1, 2] : vector<1x1x128xf32> to vector<1xf32>
    %67 = vector.shape_cast %66 : vector<1xf32> to vector<1x1x1xf32>
    %68 = vector.extract %67[0, 0, 0] : f32 from vector<1x1x1xf32>
    %69 = tpu.iota {dimensions = array<i32: 2>} : vector<1x1x128xi32>
    %c0_i32 = arith.constant 0 : i32
    %70 = vector.broadcast %c0_i32 : i32 to vector<1x1x128xi32>
    %71 = arith.cmpi eq, %69, %70 : vector<1x1x128xi32>
    %c1_i32 = arith.constant 1 : i32
    %72 = vector.broadcast %c1_i32 : i32 to vector<1x1x128xi32>
    %73 = arith.cmpi eq, %69, %72 : vector<1x1x128xi32>
    %c2_i32 = arith.constant 2 : i32
    %74 = vector.broadcast %c2_i32 : i32 to vector<1x1x128xi32>
    %75 = arith.cmpi eq, %69, %74 : vector<1x1x128xi32>
    %cst_16 = arith.constant 0.000000e+00 : f32
    %76 = vector.broadcast %68 : f32 to vector<1x1x128xf32>
    %77 = vector.broadcast %cst_16 : f32 to vector<1x1x128xf32>
    %78 = arith.select %75, %76, %77 : vector<1x1x128xi1>, vector<1x1x128xf32>
    %79 = vector.broadcast %64 : f32 to vector<1x1x128xf32>
    %80 = arith.select %73, %79, %78 : vector<1x1x128xi1>, vector<1x1x128xf32>
    %81 = vector.broadcast %60 : f32 to vector<1x1x128xf32>
    %82 = arith.select %71, %81, %80 : vector<1x1x128xi1>, vector<1x1x128xf32>
    %c0_17 = arith.constant 0 : index
    %c0_18 = arith.constant 0 : index
    %c0_19 = arith.constant 0 : index
    %83 = vector.load %arg4[%c0_17, %c0_18, %c0_19] : memref<1x1x128xf32, #tpu.memory_space<vmem>>, vector<1x1x128xf32>
    tpu.vector_store %arg4[%c0_17, %c0_18, %c0_19], %82 {strides = array<i32>} : memref<1x1x128xf32, #tpu.memory_space<vmem>>, vector<1x1x128xf32>,
    %84 = arith.subf %29, %33 : vector<3x128xf32>
    %85 = math.absf %84 : vector<3x128xf32>
    %c0_20 = arith.constant 0 : index
    %c0_21 = arith.constant 0 : index
    %86 = vector.load %arg3[%c0_20, %c0_21] : memref<3x128xf32, #tpu.memory_space<vmem>>, vector<3x128xf32>
    tpu.vector_store %arg3[%c0_20, %c0_21], %85 {strides = array<i32>} : memref<3x128xf32, #tpu.memory_space<vmem>>, vector<3x128xf32>,
    return
  }
  func.func @transform_0(%arg0: i32) -> (i32, i32) {
    %c0_i32 = arith.constant 0 : i32
    %c0_i32_0 = arith.constant 0 : i32
    return %c0_i32, %arg0 : i32, i32
  }
  func.func @transform_1(%arg0: i32) -> (i32, i32) {
    %c0_i32 = arith.constant 0 : i32
    %c0_i32_0 = arith.constant 0 : i32
    return %c0_i32, %arg0 : i32, i32
  }
  func.func @transform_2(%arg0: i32) -> (i32, i32) {
    %c0_i32 = arith.constant 0 : i32
    %c0_i32_0 = arith.constant 0 : i32
    return %c0_i32, %arg0 : i32, i32
  }
  func.func @transform_3(%arg0: i32) -> (i32, i32, i32) {
    %c0_i32 = arith.constant 0 : i32
    %c0_i32_0 = arith.constant 0 : i32
    %c0_i32_1 = arith.constant 0 : i32
    return %arg0, %c0_i32, %c0_i32_0 : i32, i32, i32
  }
}

</mosaic_0001>

<bundles_post_ra>
// kernel: sum_mse_cosine_loss.1
= control target key start
LH: loop header
LB: loop body
LE: loop exit
PB: predicated region body
PF: predicated region fallthrough
CT: control target
= control target key end

     0   :  { %v15_v0 = vlaneseq  ;;  %vm26_vm1 = vcmask 1042432   ;;  %vm111_vm2 = vcmask 1043456   ;;  %vm119_vm3 = vcmask 1040384   ;;  %s237_s0 = inlined_call_operand.vmem [shape: f32[7,128], index: 0, kind: input, shape index: {}]   ;;  %s238_s1 = inlined_call_operand.vmem [shape: f32[7,128], index: 1, kind: input, shape index: {}]   ;;  %s239_s2 = inlined_call_operand.vmem [shape: f32[3,128], index: 2, kind: output, shape index: {0}]   ;;  %s240_s3 = inlined_call_operand.vmem [shape: f32[1,1,128], index: 3, kind: output, shape index: {1}]  }
   0x1   :  { %v13_v1 = vld [vmem:[%s237_s0] sm:$0x7f] }
   0x2   :  { %v14_v2 = vld [vmem:[%s238_s1] sm:$0x7f]  ;;  %v217_v3 = vand.u32 127, %v15_v0 }
   0x4   :  { %vm20_vm0 = vcmp.lt.s32.totalorder %v217_v3, 8  ;;  %vm152_vm12 = vcmp.eq.s32.totalorder %v217_v3, 2  ;;  %vm151_vm13 = vcmp.eq.s32.totalorder %v217_v3, 1  ;;  %vm150_vm14 = vcmp.eq.s32.totalorder %v217_v3, 0 }
   0x5   :  { %v23_v4 = vsel %vm20_vm0, %v13_v1, 0.0  ;;  %v24_v5 = vsel %vm20_vm0, %v14_v2, 0.0 }
   0x6   :  { %v41_v6 = vmul.f32 %v24_v5, %v24_v5  ;;  %v106_v7 = vsub.f32 %v23_v4, %v24_v5  ;;  %v25_v8 = vmul.f32 %v23_v4, %v23_v4 }
   0x8   :  { %v42_v9 = vsel %vm26_vm1, %v41_v6, 0.0  ;;  %v107_v10 = vmul.f32 %v106_v7, %v106_v7  ;;  %v27_v11 = vsel %vm26_vm1, %v25_v8, 0.0 }
   0x9   :  { %v43_v12 = vrot.slane %v42_v9, 4  ;;  %v28_v13 = vrot.slane %v27_v11, 4 }
   0xa   :  { %v109_v14 = vrot.slane %v107_v10, 3 }
   0xb   :  { %v44_v15 = vadd.f32 %v43_v12, %v42_v9  ;;  %v29_v16 = vadd.f32 %v28_v13, %v27_v11 }
   0xc   :  { %v112_v17 = vsel %vm111_vm2, %v109_v14, 0.0 }
   0xd   :  { %v45_v18 = vrot.slane %v44_v15, 2  ;;  %v113_v19 = vrot.slane %v112_v17, 4  ;;  %v30_v20 = vrot.slane %v29_v16, 2 }
   0xf   :  { %v46_v21 = vadd.f32 %v45_v18, %v44_v15  ;;  %v114_v22 = vadd.f32 %v113_v19, %v112_v17  ;;  %v31_v23 = vadd.f32 %v30_v20, %v29_v16 }
  0x11   :  { %v47_v24 = vrot.slane %v46_v21, 1  ;;  %v115_v25 = vrot.slane %v114_v22, 2  ;;  %v32_v26 = vrot.slane %v31_v23, 1 }
  0x13   :  { %v48_v27 = vadd.f32 %v47_v24, %v46_v21  ;;  %v116_v28 = vadd.f32 %v115_v25, %v114_v22  ;;  %v33_v29 = vadd.f32 %v32_v26, %v31_v23 }
  0x15   :  { %177 = vrsqrt.f32 %v48_v27  ;;  %v117_v30 = vrot.slane %v116_v28, 1  ;;  %vm51_vm4 = vcmp.eq.f32.partialorder %v48_v27, inf  ;;  %v54_v34 = vand.u32 2147483648, %v48_v27 }
  0x16   :  { %179 = vrsqrt.f32 %v33_v29  ;;  %vm53_vm5 = vcmp.eq.f32.partialorder %v48_v27, 0.0  ;;  %vm36_vm6 = vcmp.eq.f32.partialorder %v33_v29, inf  ;;  %v39_v37 = vand.u32 2147483648, %v33_v29 }
  0x17   :  { %v118_v31 = vadd.f32 %v117_v30, %v116_v28  ;;  %vm38_vm7 = vcmp.eq.f32.partialorder %v33_v29, 0.0 }
  0x19   :  { %v140_v32 = vsel %vm119_vm3, %v118_v31, 0.0 }
  0x1a   :  { %141 = vadd.xlane.f32.xlu1 %v140_v32 }
  0x1f   :  { %v178_v33 = vpop.eup %177 }
  0x20   :  { %v180_v35 = vpop.eup %179  ;;  %v50_v36 = vmul.f32 %v178_v33, %v48_v27 }
  0x21   :  { %v35_v38 = vmul.f32 %v180_v35, %v33_v29 }
  0x22   :  { %v52_v39 = vsel %vm51_vm4, %v48_v27, %v50_v36 }
  0x23   :  { %v55_v40 = vsel %vm53_vm5, %v54_v34, %v52_v39  ;;  %v37_v41 = vsel %vm36_vm6, %v33_v29, %v35_v38 }
  0x24   :  { %v59_v42 = vmax.f32 %v55_v40, 1e-12  ;;  %v40_v43 = vsel %vm38_vm7, %v39_v37, %v37_v41 }
  0x25   :  { %v56_v44 = vmax.f32 %v40_v43, 1e-12  ;;  %v104_v24 = vsub.f32 %v40_v43, %v55_v40 }
  0x26   :  { %181 = vrcp.f32 %v59_v42 }
  0x27   :  { %183 = vrcp.f32 %v56_v44  ;;  %v105_v27 = vmul.f32 %v104_v24, %v104_v24 }
  0x29   :  { %v130_v29 = vsel %vm119_vm3, %v105_v27, 0.0 }
  0x30   :  { %v182_v45 = vpop.eup %181 }
  0x31   :  { %v184_v46 = vpop.eup %183  ;;  %v61_v47 = vmul.f32 %v182_v45, %v24_v5 }
  0x32   :  { %v58_v48 = vmul.f32 %v184_v46, %v23_v4 }
  0x33   :  { %v85_v49 = vmul.f32 %v61_v47, %v61_v47 }
  0x34   :  { %v70_v50 = vmul.f32 %v58_v48, %v58_v48  ;;  %v160_v51 = vsub.f32 %v58_v48, %v61_v47  ;;  %v62_v4 = vmul.f32 %v61_v47, %v58_v48 }
  0x35   :  { %v86_v52 = vsel %vm26_vm1, %v85_v49, 0.0 }
  0x36   :  { %v87_v53 = vrot.slane %v86_v52, 4  ;;  %v71_v54 = vsel %vm26_vm1, %v70_v50, 0.0  ;;  %v161_v55 = vand.u32 2147483647, %v160_v51  ;;  %v63_v5 = vsel %vm26_vm1, %v62_v4, 0.0 }
  0x37   :  { %v72_v56 = vrot.slane %v71_v54, 4  ;;  %v64_v6 = vrot.slane %v63_v5, 4 }
  0x38   :  { %v88_v57 = vadd.f32 %v87_v53, %v86_v52  ;;  %162 = vst [vmem:[%s239_s2] sm:$0x7] %v161_v55 }
  0x39   :  { %v73_v58 = vadd.f32 %v72_v56, %v71_v54  ;;  %v65_v8 = vadd.f32 %v64_v6, %v63_v5 }
  0x3a   :  { %v89_v59 = vrot.slane %v88_v57, 2 }
  0x3b   :  { %v74_v60 = vrot.slane %v73_v58, 2  ;;  %v66_v17 = vrot.slane %v65_v8, 2 }
  0x3c   :  { %v90_v61 = vadd.f32 %v89_v59, %v88_v57 }
  0x3d   :  { %v75_v62 = vadd.f32 %v74_v60, %v73_v58  ;;  %v67_v21 = vadd.f32 %v66_v17, %v65_v8 }
  0x3e   :  { %v91_v63 = vrot.slane %v90_v61, 1 }
  0x3f   :  { %v76_v0 = vrot.slane %v75_v62, 1  ;;  %v68_v22 = vrot.slane %v67_v21, 1 }
  0x40   :  { %v92_v1 = vadd.f32 %v91_v63, %v90_v61 }
  0x41   :  { %v77_v2 = vadd.f32 %v76_v0, %v75_v62  ;;  %v69_v23 = vadd.f32 %v68_v22, %v67_v21 }
  0x42   :  { %185 = vrsqrt.f32 %v92_v1  ;;  %vm95_vm8 = vcmp.eq.f32.partialorder %v92_v1, inf  ;;  %v98_v9 = vand.u32 2147483648, %v92_v1  ;;  %vm97_vm10 = vcmp.eq.f32.partialorder %v92_v1, 0.0 }
  0x43   :  { %187 = vrsqrt.f32 %v77_v2  ;;  %vm80_vm9 = vcmp.eq.f32.partialorder %v77_v2, inf  ;;  %v83_v11 = vand.u32 2147483648, %v77_v2  ;;  %vm82_vm11 = vcmp.eq.f32.partialorder %v77_v2, 0.0 }
  0x4c   :  { %v186_v7 = vpop.eup %185 }
  0x4d   :  { %v188_v10 = vpop.eup %187  ;;  %v94_v12 = vmul.f32 %v186_v7, %v92_v1 }
  0x4e   :  { %v79_v13 = vmul.f32 %v188_v10, %v77_v2 }
  0x4f   :  { %v96_v14 = vsel %vm95_vm8, %v92_v1, %v94_v12 }
  0x50   :  { %v81_v15 = vsel %vm80_vm9, %v77_v2, %v79_v13  ;;  %v99_v16 = vsel %vm97_vm10, %v98_v9, %v96_v14 }
  0x51   :  { %v84_v18 = vsel %vm82_vm11, %v83_v11, %v81_v15 }
  0x52   :  { %v100_v19 = vmul.f32 %v99_v16, %v84_v18 }
  0x54   :  { %v101_v20 = vmax.f32 %v100_v19, 1e-08 }
  0x56   :  { %189 = vrcp.f32 %v101_v20 }
  0x60   :  { %v190_v25 = vpop.eup %189 }
  0x61   :  { %v103_v26 = vmul.f32 %v190_v25, %v69_v23 }
  0x63   :  { %v120_v28 = vsel %vm119_vm3, %v103_v26, 0.0 }
  0x64   :  { %121 = vadd.xlane.f32.xlu0 %v120_v28 }
  0x68   :  { %131 = vadd.xlane.f32.xlu0 %v130_v29 }
  0xa7   :  { %v142_v30 = vpop.xlane.xlu1 %141 }
  0xa8   :  { %v143_v31 = vrot.slane %v142_v30, 4 }
  0xaa   :  { %v144_v32 = vadd.f32 %v143_v31, %v142_v30 }
  0xac   :  { %v145_v36 = vrot.slane %v144_v32, 2 }
  0xae   :  { %v146_v42 = vadd.f32 %v145_v36, %v144_v32 }
  0xb0   :  { %v147_v47 = vrot.slane %v146_v42, 1 }
  0xb2   :  { %v148_v50 = vadd.f32 %v147_v47, %v146_v42 }
  0xf1   :  { %v122_v33 = vpop.xlane.xlu0 %121 }
  0xf2   :  { %v123_v34 = vrot.slane %v122_v33, 4 }
  0xf4   :  { %v124_v35 = vadd.f32 %v123_v34, %v122_v33 }
  0xf5   :  { %v132_v37 = vpop.xlane.xlu0 %131 }
  0xf6   :  { %v125_v38 = vrot.slane %v124_v35, 2  ;;  %v133_v39 = vrot.slane %v132_v37, 4 }
  0xf8   :  { %v134_v40 = vadd.f32 %v133_v39, %v132_v37  ;;  %v126_v41 = vadd.f32 %v125_v38, %v124_v35 }
  0xfa   :  { %v135_v43 = vrot.slane %v134_v40, 2  ;;  %v127_v44 = vrot.slane %v126_v41, 1 }
  0xfc   :  { %v136_v45 = vadd.f32 %v135_v43, %v134_v40  ;;  %v128_v46 = vadd.f32 %v127_v44, %v126_v41 }
  0xfe   :  { %171 = vpush %v128_v46  ;;  %v137_v48 = vrot.slane %v136_v45, 1 }
 0x100   :  { %v138_v49 = vadd.f32 %v137_v48, %v136_v45 }
 0x102   :  { %173 = vpush %v138_v49 }
 0x103   :  { %175 = vpush %v148_v50 }
 0x12f   :  { %s172_s2 = spop %171 }
 0x130   :  { %v157_v54 = vstv %s172_s2 }
 0x133   :  { %s174_s16 = spop %173 }
 0x134   :  { %v155_v51 = vstv %s174_s16  ;;  %s176_s17 = spop %175 }
 0x135   :  { %v153_v52 = vstv %s176_s17 }
 0x136   :  { %v154_v53 = vsel %vm152_vm12, %v153_v52, 0.0 }
 0x137   :  { %v156_v55 = vsel %vm151_vm13, %v155_v51, %v154_v53 }
 0x138   :  { %v158_v56 = vsel %vm150_vm14, %v157_v54, %v156_v55 }
 0x139   :  { %159 = vst [vmem:[%s240_s3] sm:$0x1] %v158_v56 }

</bundles_post_ra>
